<compile_context>
chip_gen: v5e
topology: v5e:2x2
jax: 0.10.0
libtpu: 0.0.40
codegen_flags: <defaults>
</compile_context>

<pallas_src>
import jax
import jax.numpy as jnp
from jax.experimental import pallas as pl
from jax.experimental.pallas import tpu as pltpu


def _cifnorm_kernel(x_ref, mb_ref, o_ref):
    # x_ref:  (block_rows, block_L) input tile
    # mb_ref: (block_rows, 2)       per-row constants: [:, 0] = mean, [:, 1] = 1/stdev
    # o_ref:  (block_rows, block_L) output tile
    mean = mb_ref[:, 0:1]
    inv_std = mb_ref[:, 1:2]
    o_ref[...] = ((x_ref[...] - mean) * inv_std).astype(o_ref.dtype)


def _hw_plan():
    """Per-generation block target / VMEM limit / minimum row-block count."""
    vmem = 64 << 20
    try:
        info = pltpu.get_tpu_info()
        vmem = int(getattr(info, "vmem_capacity_bytes", vmem))
    except Exception:
        pass
    if vmem <= (64 << 20):
        # v7x-class: 64 MiB VMEM, ~3.2 TB/s HBM, 2 TensorCores. Bigger blocks amortize
        # the ~0.35 us/step grid overhead; 2*(8+8) MiB double-buffered + aux < 40 MiB.
        return dict(target_bytes=8 << 20, vmem_limit=40 << 20, min_row_blocks=4)
    # v5e/v6e-class: 128 MiB physical VMEM, single TensorCore.
    return dict(target_bytes=4 << 20, vmem_limit=48 << 20, min_row_blocks=1)


def _block_plan(R, L, itemsize, target_bytes, min_row_blocks):
    """Pick (block_rows, block_L) honoring the (sublane, 128) rules and ~target bytes."""
    sub = max(8, 32 // itemsize)          # 8 for f32, 16 for bf16, 32 for int8/fp8
    row_bytes = L * itemsize
    if sub * row_bytes <= target_bytes:
        # Full-width (lane-dense) rows; tile over rows only.
        block_L = L
        block_rows = max(sub, (target_bytes // row_bytes) // sub * sub)
        # Keep at least `min_row_blocks` row blocks (feeds both v7x TensorCores).
        if min_row_blocks > 1 and (R // min_row_blocks) >= sub:
            block_rows = min(block_rows, (R // min_row_blocks) // sub * sub)
        block_rows = min(block_rows, R)   # full extent is always legal
    else:
        # Very large H*W: minimum row count, tile the lane dimension too.
        block_rows = min(R, sub)
        block_L = max(128, (target_bytes // (block_rows * itemsize)) // 128 * 128)
        block_L = min(block_L, L)
    return block_rows, block_L


def cifnorm(x, mean, stdev, *, out_dtype=None, donate_input=False):
    """(x - mean) / stdev with per-channel broadcast, NCHW layout."""
    N, C, H, W = x.shape
    assert mean.shape == (1, C, 1, 1) and stdev.shape == (1, C, 1, 1)
    out_dtype = x.dtype if out_dtype is None else jnp.dtype(out_dtype)

    R = N * C          # one row per (image, channel)
    L = H * W          # lane-dense last dim (spatial slab)

    # Free view for a contiguous NCHW array.
    x2 = x.reshape(R, L)

    # One consolidated per-row constant stream: [:, 0] = mean, [:, 1] = 1/stdev.
    # (C divisions done once here; the kernel does a single sub + mul per element.)
    mb = jnp.stack(
        [mean.reshape(C).astype(jnp.float32),
         (1.0 / stdev.reshape(C)).astype(jnp.float32)],
        axis=-1,
    )                                                 # (C, 2)
    mb_rows = jnp.broadcast_to(mb[None], (N, C, 2)).reshape(R, 2)

    plan = _hw_plan()
    block_rows, block_L = _block_plan(
        R, L, jnp.dtype(x.dtype).itemsize,
        plan["target_bytes"], plan["min_row_blocks"],
    )
    grid = (pl.cdiv(R, block_rows), pl.cdiv(L, block_L))

    out2 = pl.pallas_call(
        _cifnorm_kernel,
        out_shape=jax.ShapeDtypeStruct((R, L), out_dtype),
        grid_spec=pltpu.PrefetchScalarGridSpec(
            num_scalar_prefetch=0,
            grid=grid,
            in_specs=[
                pl.BlockSpec((block_rows, block_L), lambda i, j: (i, j)),
                pl.BlockSpec((block_rows, 2), lambda i, j: (i, 0)),
            ],
            out_specs=pl.BlockSpec((block_rows, block_L), lambda i, j: (i, j)),
        ),
        compiler_params=pltpu.CompilerParams(
            dimension_semantics=("parallel", "parallel"),
            vmem_limit_bytes=plan["vmem_limit"],
        ),
        input_output_aliases=(
            {0: 0} if (donate_input and out_dtype == x.dtype) else {}
        ),
    )(x2, mb_rows)

    return out2.reshape(N, C, H, W)


if __name__ == "__main__":
    # Deterministic buffers, exactly as in the PyTorch module's __init__ (C = 3).
    mean = jnp.asarray([0.4914, 0.4822, 0.4465], dtype=jnp.float32)[
        None, :, None, None
    ]
    stdev = jnp.asarray([0.2023, 0.1994, 0.201], dtype=jnp.float32)[
        None, :, None, None
    ]

    # Small NCHW input consistent with CIFAR-style data: batch=2, C=3, 16x16.
    key = jax.random.PRNGKey(0)
    x = jax.random.uniform(key, (2, 3, 16, 16), dtype=jnp.float32)

    out = jax.block_until_ready(cifnorm(x, mean, stdev))

    # Reference check in plain JAX (same broadcasting semantics as PyTorch).
    ref = (x - mean) / stdev
    assert out.shape == x.shape and out.dtype == x.dtype
    assert jnp.allclose(out, ref, rtol=1e-5, atol=1e-6)

    print("KERNEL_OK")
</pallas_src>

<mosaic_0001>
module attributes {stable_mosaic.version = 11 : i64} {
  func.func @_cifnorm_kernel(%arg0: i32, %arg1: i32, %arg2: memref<6x256xf32, #tpu.memory_space<vmem>>, %arg3: memref<6x2xf32, #tpu.memory_space<vmem>>, %arg4: memref<6x256xf32, #tpu.memory_space<vmem>>) attributes {dimension_semantics = [#tpu.dimension_semantics<parallel>, #tpu.dimension_semantics<parallel>], iteration_bounds = array<i64: 1, 1>, scalar_prefetch = 0 : i64, scratch_operands = 0 : i64, tpu.core_type = #tpu.core_type<tc>, window_params = [{transform_indices = @transform_0, window_bounds = array<i64: 6, 256>}, {transform_indices = @transform_1, window_bounds = array<i64: 6, 2>}, {transform_indices = @transform_2, window_bounds = array<i64: 6, 256>}]} {
    %c0 = arith.constant 0 : index
    %c0_0 = arith.constant 0 : index
    %0 = vector.load %arg3[%c0, %c0_0] : memref<6x2xf32, #tpu.memory_space<vmem>>, vector<6x1xf32>
    %c0_1 = arith.constant 0 : index
    %c1 = arith.constant 1 : index
    %1 = vector.load %arg3[%c0_1, %c1] : memref<6x2xf32, #tpu.memory_space<vmem>>, vector<6x1xf32>
    %c0_2 = arith.constant 0 : index
    %c0_3 = arith.constant 0 : index
    %2 = vector.load %arg2[%c0_2, %c0_3] : memref<6x256xf32, #tpu.memory_space<vmem>>, vector<6x256xf32>
    %3 = vector.broadcast %0 : vector<6x1xf32> to vector<6x256xf32>
    %4 = arith.subf %2, %3 : vector<6x256xf32>
    %5 = vector.broadcast %1 : vector<6x1xf32> to vector<6x256xf32>
    %6 = arith.mulf %4, %5 : vector<6x256xf32>
    %c0_4 = arith.constant 0 : index
    %c0_5 = arith.constant 0 : index
    %7 = vector.load %arg4[%c0_4, %c0_5] : memref<6x256xf32, #tpu.memory_space<vmem>>, vector<6x256xf32>
    tpu.vector_store %arg4[%c0_4, %c0_5], %6 {strides = array<i32>} : memref<6x256xf32, #tpu.memory_space<vmem>>, vector<6x256xf32>,
    return
  }
  func.func @transform_0(%arg0: i32, %arg1: i32) -> (i32, i32) {
    %c0_i32 = arith.constant 0 : i32
    return %arg0, %arg1 : i32, i32
  }
  func.func @transform_1(%arg0: i32, %arg1: i32) -> (i32, i32) {
    %c0_i32 = arith.constant 0 : i32
    %c0_i32_0 = arith.constant 0 : i32
    return %arg0, %c0_i32 : i32, i32
  }
  func.func @transform_2(%arg0: i32, %arg1: i32) -> (i32, i32) {
    %c0_i32 = arith.constant 0 : i32
    return %arg0, %arg1 : i32, i32
  }
}

</mosaic_0001>

<bundles_post_ra>
// kernel: tpu_custom_call.1
= control target key start
LH: loop header
LB: loop body
LE: loop exit
PB: predicated region body
PF: predicated region fallthrough
CT: control target
= control target key end

     0   :  { %7 = vsyncpa [#allocation3], 0  ;;  %s147_s0 = inlined_call_operand.hbm [shape: f32[6,256], index: 0, kind: input, shape index: {}]   ;;  %s148_s1 = inlined_call_operand.vmem [shape: f32[6,2], index: 1, kind: input, shape index: {}]   ;;  %s149_s2 = inlined_call_operand.hbm [shape: f32[6,256], index: 2, kind: output, shape index: {}]  }
   0x1   :  { %8 = vsyncpa [#allocation4], 0  ;;  %s14_s11 = sshll.u32 %s147_s0, 4  ;;  %s119_s12 = smov [#allocation2]   ;;  %s15_s11 = int_to_ptr.hbm [resolvable:$true] %s14_s11 }
   0x2   :  { %s16_s13 = sshll.u32 %s119_s12, 4  ;;  %s17_s13 = int_to_ptr.vmem [resolvable:$true] %s16_s13 }
   0x3   :  { %19 = dma.hbm_to_vmem [thread:$0]  %s15_s11, 256, %s17_s13, [#allocation3]  }
   0x4   :  { %115 = dma.done.wait [#allocation3], 256  }
   0x5   :  { %116 = vsyncadd [#allocation3], 4294967040  ;;  %v120_v0 = vmov 0   ;;  %v26_v1 = vld [vmem:[%s148_s1] sm:$0x3f]  ;;  %v121_v2 = vmov 1  }
   0x6   :  { %65 = vset.pattern.permute.xlu0 %v120_v0  ;;  %v27_v4 = vld [vmem:[#allocation2] sm:$0x3f]  ;;  %v28_v5 = vld [vmem:[#allocation2 + $0x8] sm:$0x3f]  ;;  %s122_s0 = smov [#allocation5]   ;;  %s51_s19 = sshll.u32 %s149_s2, 4  ;;  %s52_s19 = int_to_ptr.hbm [resolvable:$true] %s51_s19 }
   0x7   :  { %31 = vperm.xlu0 %65, %v26_v1   ;;  %s49_s16 = sshll.u32 %s122_s0, 4  ;;  %s50_s16 = int_to_ptr.vmem [resolvable:$true] %s49_s16 }
   0xf   :  { %66 = vset.pattern.permute.xlu0 %v121_v2 }
  0x10   :  { %37 = vperm.xlu0 %66, %v26_v1  }
  0x79   :  { %v32_v3 = vpop.permute.xlu0 %31 }
  0x7a   :  { %v34_v6 = vsub.f32 %v27_v4, %v32_v3  ;;  %v35_v7 = vsub.f32 %v28_v5, %v32_v3 }
  0x82   :  { %v38_v8 = vpop.permute.xlu0 %37 }
  0x83   :  { %v40_v9 = vmul.f32 %v38_v8, %v34_v6  ;;  %v41_v10 = vmul.f32 %v38_v8, %v35_v7 }
  0x85   :  { %42 = vst [vmem:[#allocation5] sm:$0x3f] %v40_v9 }
  0x86   :  { %43 = vst [vmem:[#allocation5 + $0x8] sm:$0x3f] %v41_v10 }
  0x87   :  { %54 = dma.vmem_to_hbm [thread:$0]  %s50_s16, 256, %s52_s19, [#allocation4]  }
  0x88   :  { %117 = dma.done.wait [#allocation4], 256  }
  0x89   :  { %118 = vsyncadd [#allocation4], 4294967040 }
  0x8a   :  { %59 = vsyncpa [#allocation3], 1 }
  0x8b   :  { %60 = vsyncpa [#allocation4], 1 }

</bundles_post_ra>
